<compile_context>
chip_gen: v7x
topology: tpu7x:2x2x1
jax: 0.10.0
libtpu: 0.0.40
codegen_flags: <defaults>
</compile_context>

<pallas_src>
import jax
import jax.numpy as jnp
from jax import lax
from jax.experimental import pallas as pl
from jax.experimental.pallas import tpu as pltpu


def lstm_fused_kernel(x_ref, w_ih_ref, bias_ref, w_hh_ref, w_out_ref, b_out_ref,
                      logits_ref):
    """Fused input projection + LSTM recurrence + output linear (grid-less).

    x_ref      : (T*B, E) f32   time-major embedded tokens
    w_ih_ref   : (E, 4H)  f32
    bias_ref   : (1, 4H)  f32   (b_ih + b_hh)
    w_hh_ref   : (4H, 4H) bf16  rows [H, 4H) are zero
    w_out_ref  : (4H, O)  f32   rows [H, 4H) are zero
    b_out_ref  : (1, O)   f32
    logits_ref : (B, O)   f32
    """
    B, _ = logits_ref.shape
    TB, _ = x_ref.shape
    T = TB // B
    G = w_ih_ref.shape[1]                  # 4H  (== 128 here -> one vreg of lanes)
    H = G // 4

    # -------- Prologue: hoisted input projection, ONE big matmul for all steps -----
    gates_x = jnp.dot(x_ref[...], w_ih_ref[...],
                      preferred_element_type=jnp.float32) + bias_ref[...]   # (T*B, 4H)

    # Whole-vreg activation mask (hoisted out of the loop): lanes [2H, 3H) hold the
    # g-gate (tanh); everything else sigmoid.
    lane = lax.broadcasted_iota(jnp.int32, (B, G), 1)
    is_g = (lane >= 2 * H) & (lane < 3 * H)

    w_hh = w_hh_ref[...]                   # bf16, resident for the whole recurrence

    def lstm_step(gates, c_prev):
        # Two full-vreg transcendentals instead of five quarter-vreg ones.
        act = jnp.where(is_g, jnp.tanh(gates), jax.nn.sigmoid(gates))
        # Align gate groups onto lanes [0, H) with XLU rotations:
        #   roll 2H -> g, roll 3H -> f, roll H -> o land on the i-gate lanes.
        ig = act * pltpu.roll(act, 2 * H, axis=1)                 # lanes[0,H) = i*g
        c_new = pltpu.roll(act, 3 * H, axis=1) * c_prev + ig      # lanes[0,H) = f*c+i*g
        h_new = pltpu.roll(act, H, axis=1) * jnp.tanh(c_new)      # lanes[0,H) = o*tanh
        # Lanes >= H of h_new / c_new hold garbage; the zero rows [H, 4H) of W_hh and
        # W_out guarantee they never contaminate the result.
        return h_new, c_new

    # -------- t = 0 peeled: h0 == c0 == 0, so no recurrent matmul on this step -----
    g0 = gates_x[0:B, :]
    act0 = jnp.where(is_g, jnp.tanh(g0), jax.nn.sigmoid(g0))
    c = act0 * pltpu.roll(act0, 2 * H, axis=1)                    # i * g
    h = pltpu.roll(act0, H, axis=1) * jnp.tanh(c)                 # o * tanh(c)

    # -------- Serial recurrence, t = 1 .. T-1 (fully unrolled, T is tiny) ----------
    # TODO(synk): for non-toy T use a bounded unroll and a time-chunked grid with
    # double-buffered gates blocks + h/c in VMEM scratch, sized for v7x's 64 MiB VMEM
    # (32 MiB scoped default, set vmem_limit_bytes explicitly).
    for t in range(1, T):
        gates = gates_x[t * B:(t + 1) * B, :] + jnp.dot(
            h.astype(jnp.bfloat16), w_hh, preferred_element_type=jnp.float32)
        h, c = lstm_step(gates, c)

    # -------- Epilogue: output linear on the final hidden state --------------------
    logits_ref[...] = (jnp.dot(h, w_out_ref[...], preferred_element_type=jnp.float32)
                       + b_out_ref[...])


def lstm_classifier_forward(token_ids, params):
    """token_ids: (B, T) int32 -> logits (B, output_size)."""
    embed_table = params["embed"]        # (V, E)
    w_ih = params["w_ih"]                # (E, 4H)
    w_hh = params["w_hh"]                # (H, 4H)
    bias = params["bias"]                # (1, 4H) = b_ih + b_hh
    w_out = params["w_out"]              # (H, O)
    b_out = params["b_out"]              # (1, O)

    B, T = token_ids.shape
    E = embed_table.shape[1]
    H = w_hh.shape[0]
    G = 4 * H
    O = w_out.shape[1]

    # Embedding gather directly in time-major order (transpose the tiny (B,T) int32
    # ids, not the (T,B,E) activations), flattened so the kernel prologue can run one
    # (T*B, E) @ (E, 4H) matmul.
    # TODO(synk): for large vocab*E fuse the gather in-kernel (token ids via scalar
    # prefetch / SMEM) instead of materializing (T*B, E) in HBM.
    x_tm = embed_table[token_ids.T].reshape(T * B, E)

    # Zero-pad recurrent / output weights to 4H rows so the kernel keeps h as a full
    # (B, 4H) lane vector with no per-step lane slicing; recurrent weight is cast to
    # bf16 (MXU operands; accumulation stays f32). In production prepare these once.
    w_hh_pad = jnp.zeros((G, G), jnp.bfloat16).at[:H, :].set(w_hh.astype(jnp.bfloat16))
    w_out_pad = jnp.zeros((G, O), jnp.float32).at[:H, :].set(w_out)

    vmem = pl.BlockSpec(memory_space=pltpu.MemorySpace.VMEM)
    # Single grid-less invocation: all operands (< 100 KB total) are VMEM resident.
    # TODO(synk): on v7x with production batch sizes add a leading "parallel" batch
    # grid axis so both TensorCores each run half the batch (not at B=8 — it would
    # drop sublane occupancy below 8/8).
    return pl.pallas_call(
        lstm_fused_kernel,
        out_shape=jax.ShapeDtypeStruct((B, O), jnp.float32),
        in_specs=[vmem, vmem, vmem, vmem, vmem, vmem],
        out_specs=vmem,
    )(x_tm, w_ih, bias, w_hh_pad, w_out_pad, b_out)


def reference_forward(token_ids, params):
    """Pure-JAX f32 reference of the same forward (for correctness check)."""
    embed = params["embed"][token_ids]               # (B, T, E)
    w_ih, w_hh, bias = params["w_ih"], params["w_hh"], params["bias"]
    H = w_hh.shape[0]
    B = token_ids.shape[0]

    def step(carry, x_t):
        h, c = carry
        g = x_t @ w_ih + h @ w_hh + bias[0]
        i = jax.nn.sigmoid(g[:, 0 * H:1 * H])
        f = jax.nn.sigmoid(g[:, 1 * H:2 * H])
        gg = jnp.tanh(g[:, 2 * H:3 * H])
        o = jax.nn.sigmoid(g[:, 3 * H:4 * H])
        c = f * c + i * gg
        h = o * jnp.tanh(c)
        return (h, c), None

    h0 = jnp.zeros((B, H), jnp.float32)
    (h, _), _ = lax.scan(step, (h0, h0), jnp.transpose(embed, (1, 0, 2)))
    return h @ params["w_out"] + params["b_out"][0]


def init_params(key, vocab_size, embedding_length, hidden_size, output_size):
    ks = jax.random.split(key, 6)
    bound = 1.0 / jnp.sqrt(hidden_size)
    return {
        "embed": jax.random.normal(ks[0], (vocab_size, embedding_length), jnp.float32),
        # stored pre-transposed: (E, 4H) / (H, 4H), PyTorch gate order i,f,g,o
        "w_ih": jax.random.uniform(ks[1], (embedding_length, 4 * hidden_size),
                                   jnp.float32, -bound, bound),
        "w_hh": jax.random.uniform(ks[2], (hidden_size, 4 * hidden_size),
                                   jnp.float32, -bound, bound),
        # combined b_ih + b_hh
        "bias": jax.random.uniform(ks[3], (1, 4 * hidden_size),
                                   jnp.float32, -bound, bound),
        "w_out": jax.random.uniform(ks[4], (hidden_size, output_size),
                                    jnp.float32, -bound, bound),
        "b_out": jax.random.uniform(ks[5], (1, output_size),
                                    jnp.float32, -bound, bound),
    }


if __name__ == "__main__":
    batch_size = 8        # fills the 8 f32 sublanes of one vreg; batch is the free
    seq_len = 8           # throughput axis — grow B, not anything else.
    vocab_size = 50
    embedding_length = 32
    hidden_size = 32      # 4H = 128 -> the gate vector is exactly one vreg of lanes
    output_size = 4

    key = jax.random.PRNGKey(0)
    k_tok, k_par = jax.random.split(key)

    params = init_params(k_par, vocab_size, embedding_length, hidden_size, output_size)
    token_ids = jax.random.randint(k_tok, (batch_size, seq_len), 0, vocab_size,
                                   dtype=jnp.int32)

    logits = jax.jit(lstm_classifier_forward)(token_ids, params)
    logits = jax.block_until_ready(logits)

    ref = reference_forward(token_ids, params)
    assert logits.shape == (batch_size, output_size)
    # Tolerance reflects bf16 MXU operands on the recurrent matmul (f32 accumulation);
    # use f32 weights + precision=HIGHEST if bitwise parity with PyTorch is required.
    assert jnp.allclose(logits, ref, atol=5e-3, rtol=2e-2), "mismatch vs JAX reference"

    print("KERNEL_OK")
</pallas_src>

<mosaic_0001>
module attributes {stable_mosaic.version = 11 : i64} {
  func.func @lstm_fused_kernel(%arg0: memref<64x32xf32, #tpu.memory_space<vmem>>, %arg1: memref<32x128xf32, #tpu.memory_space<vmem>>, %arg2: memref<1x128xf32, #tpu.memory_space<vmem>>, %arg3: memref<128x128xbf16, #tpu.memory_space<vmem>>, %arg4: memref<128x4xf32, #tpu.memory_space<vmem>>, %arg5: memref<1x4xf32, #tpu.memory_space<vmem>>, %arg6: memref<8x4xf32, #tpu.memory_space<vmem>>) attributes {dimension_semantics = [], scalar_prefetch = 0 : i64, scratch_operands = 0 : i64, tpu.core_type = #tpu.core_type<tc>} {
    %c0 = arith.constant 0 : index
    %c0_0 = arith.constant 0 : index
    %0 = vector.load %arg0[%c0, %c0_0] : memref<64x32xf32, #tpu.memory_space<vmem>>, vector<64x32xf32>
    %c0_1 = arith.constant 0 : index
    %c0_2 = arith.constant 0 : index
    %1 = vector.load %arg1[%c0_1, %c0_2] : memref<32x128xf32, #tpu.memory_space<vmem>>, vector<32x128xf32>
    %cst = arith.constant dense<0.000000e+00> : vector<64x128xf32>
    %2 = tpu.matmul %0, %1, %cst {dimension_numbers = #tpu.dot_dimension_numbers<[1], [0], [0], [1], [0, 0, 1, 1], [], []>} : vector<64x32xf32>, vector<32x128xf32>, vector<64x128xf32> -> vector<64x128xf32>
    %c0_3 = arith.constant 0 : index
    %c0_4 = arith.constant 0 : index
    %3 = vector.load %arg2[%c0_3, %c0_4] : memref<1x128xf32, #tpu.memory_space<vmem>>, vector<1x128xf32>
    %4 = vector.broadcast %3 : vector<1x128xf32> to vector<64x128xf32>
    %5 = arith.addf %2, %4 : vector<64x128xf32>
    %6 = tpu.iota {dimensions = array<i32: 1>} : vector<8x128xi32>
    %c64_i32 = arith.constant 64 : i32
    %7 = vector.broadcast %c64_i32 : i32 to vector<8x128xi32>
    %8 = arith.cmpi sge, %6, %7 : vector<8x128xi32>
    %c96_i32 = arith.constant 96 : i32
    %9 = vector.broadcast %c96_i32 : i32 to vector<8x128xi32>
    %10 = arith.cmpi slt, %6, %9 : vector<8x128xi32>
    %11 = arith.andi %8, %10 : vector<8x128xi1>
    %c0_5 = arith.constant 0 : index
    %c0_6 = arith.constant 0 : index
    %12 = vector.load %arg3[%c0_5, %c0_6] : memref<128x128xbf16, #tpu.memory_space<vmem>>, vector<128x128xbf16>
    %13 = vector.extract_strided_slice %5 {offsets = [0, 0], sizes = [8, 128], strides = [1, 1]} : vector<64x128xf32> to vector<8x128xf32>
    %14 = math.tanh %13 : vector<8x128xf32>
    %15 = arith.negf %13 : vector<8x128xf32>
    %16 = math.exp %15 : vector<8x128xf32>
    %cst_7 = arith.constant 1.000000e+00 : f32
    %17 = vector.broadcast %cst_7 : f32 to vector<8x128xf32>
    %18 = arith.addf %17, %16 : vector<8x128xf32>
    %19 = arith.divf %17, %18 : vector<8x128xf32>
    %20 = arith.select %11, %14, %19 : vector<8x128xi1>, vector<8x128xf32>
    %c64_i32_8 = arith.constant 64 : i32
    %21 = tpu.dynamic_rotate %20 by %c64_i32_8 dim 1 : vector<8x128xf32>, i32 -> vector<8x128xf32>
    %22 = arith.mulf %20, %21 : vector<8x128xf32>
    %c32_i32 = arith.constant 32 : i32
    %23 = tpu.dynamic_rotate %20 by %c32_i32 dim 1 : vector<8x128xf32>, i32 -> vector<8x128xf32>
    %24 = math.tanh %22 : vector<8x128xf32>
    %25 = arith.mulf %23, %24 : vector<8x128xf32>
    %26 = vector.extract_strided_slice %5 {offsets = [8, 0], sizes = [8, 128], strides = [1, 1]} : vector<64x128xf32> to vector<8x128xf32>
    %27 = arith.truncf %25 : vector<8x128xf32> to vector<8x128xbf16>
    %cst_9 = arith.constant dense<0.000000e+00> : vector<8x128xf32>
    %28 = tpu.matmul %27, %12, %cst_9 {dimension_numbers = #tpu.dot_dimension_numbers<[1], [0], [0], [1], [0, 0, 1, 1], [], []>} : vector<8x128xbf16>, vector<128x128xbf16>, vector<8x128xf32> -> vector<8x128xf32>
    %29 = arith.addf %26, %28 : vector<8x128xf32>
    %30 = math.tanh %29 : vector<8x128xf32>
    %31 = arith.negf %29 : vector<8x128xf32>
    %32 = math.exp %31 : vector<8x128xf32>
    %cst_10 = arith.constant 1.000000e+00 : f32
    %33 = vector.broadcast %cst_10 : f32 to vector<8x128xf32>
    %34 = arith.addf %33, %32 : vector<8x128xf32>
    %35 = arith.divf %33, %34 : vector<8x128xf32>
    %36 = arith.select %11, %30, %35 : vector<8x128xi1>, vector<8x128xf32>
    %c64_i32_11 = arith.constant 64 : i32
    %37 = tpu.dynamic_rotate %36 by %c64_i32_11 dim 1 : vector<8x128xf32>, i32 -> vector<8x128xf32>
    %38 = arith.mulf %36, %37 : vector<8x128xf32>
    %c96_i32_12 = arith.constant 96 : i32
    %39 = tpu.dynamic_rotate %36 by %c96_i32_12 dim 1 : vector<8x128xf32>, i32 -> vector<8x128xf32>
    %40 = arith.mulf %39, %22 : vector<8x128xf32>
    %41 = arith.addf %40, %38 : vector<8x128xf32>
    %c32_i32_13 = arith.constant 32 : i32
    %42 = tpu.dynamic_rotate %36 by %c32_i32_13 dim 1 : vector<8x128xf32>, i32 -> vector<8x128xf32>
    %43 = math.tanh %41 : vector<8x128xf32>
    %44 = arith.mulf %42, %43 : vector<8x128xf32>
    %45 = vector.extract_strided_slice %5 {offsets = [16, 0], sizes = [8, 128], strides = [1, 1]} : vector<64x128xf32> to vector<8x128xf32>
    %46 = arith.truncf %44 : vector<8x128xf32> to vector<8x128xbf16>
    %cst_14 = arith.constant dense<0.000000e+00> : vector<8x128xf32>
    %47 = tpu.matmul %46, %12, %cst_14 {dimension_numbers = #tpu.dot_dimension_numbers<[1], [0], [0], [1], [0, 0, 1, 1], [], []>} : vector<8x128xbf16>, vector<128x128xbf16>, vector<8x128xf32> -> vector<8x128xf32>
    %48 = arith.addf %45, %47 : vector<8x128xf32>
    %49 = math.tanh %48 : vector<8x128xf32>
    %50 = arith.negf %48 : vector<8x128xf32>
    %51 = math.exp %50 : vector<8x128xf32>
    %cst_15 = arith.constant 1.000000e+00 : f32
    %52 = vector.broadcast %cst_15 : f32 to vector<8x128xf32>
    %53 = arith.addf %52, %51 : vector<8x128xf32>
    %54 = arith.divf %52, %53 : vector<8x128xf32>
    %55 = arith.select %11, %49, %54 : vector<8x128xi1>, vector<8x128xf32>
    %c64_i32_16 = arith.constant 64 : i32
    %56 = tpu.dynamic_rotate %55 by %c64_i32_16 dim 1 : vector<8x128xf32>, i32 -> vector<8x128xf32>
    %57 = arith.mulf %55, %56 : vector<8x128xf32>
    %c96_i32_17 = arith.constant 96 : i32
    %58 = tpu.dynamic_rotate %55 by %c96_i32_17 dim 1 : vector<8x128xf32>, i32 -> vector<8x128xf32>
    %59 = arith.mulf %58, %41 : vector<8x128xf32>
    %60 = arith.addf %59, %57 : vector<8x128xf32>
    %c32_i32_18 = arith.constant 32 : i32
    %61 = tpu.dynamic_rotate %55 by %c32_i32_18 dim 1 : vector<8x128xf32>, i32 -> vector<8x128xf32>
    %62 = math.tanh %60 : vector<8x128xf32>
    %63 = arith.mulf %61, %62 : vector<8x128xf32>
    %64 = vector.extract_strided_slice %5 {offsets = [24, 0], sizes = [8, 128], strides = [1, 1]} : vector<64x128xf32> to vector<8x128xf32>
    %65 = arith.truncf %63 : vector<8x128xf32> to vector<8x128xbf16>
    %cst_19 = arith.constant dense<0.000000e+00> : vector<8x128xf32>
    %66 = tpu.matmul %65, %12, %cst_19 {dimension_numbers = #tpu.dot_dimension_numbers<[1], [0], [0], [1], [0, 0, 1, 1], [], []>} : vector<8x128xbf16>, vector<128x128xbf16>, vector<8x128xf32> -> vector<8x128xf32>
    %67 = arith.addf %64, %66 : vector<8x128xf32>
    %68 = math.tanh %67 : vector<8x128xf32>
    %69 = arith.negf %67 : vector<8x128xf32>
    %70 = math.exp %69 : vector<8x128xf32>
    %cst_20 = arith.constant 1.000000e+00 : f32
    %71 = vector.broadcast %cst_20 : f32 to vector<8x128xf32>
    %72 = arith.addf %71, %70 : vector<8x128xf32>
    %73 = arith.divf %71, %72 : vector<8x128xf32>
    %74 = arith.select %11, %68, %73 : vector<8x128xi1>, vector<8x128xf32>
    %c64_i32_21 = arith.constant 64 : i32
    %75 = tpu.dynamic_rotate %74 by %c64_i32_21 dim 1 : vector<8x128xf32>, i32 -> vector<8x128xf32>
    %76 = arith.mulf %74, %75 : vector<8x128xf32>
    %c96_i32_22 = arith.constant 96 : i32
    %77 = tpu.dynamic_rotate %74 by %c96_i32_22 dim 1 : vector<8x128xf32>, i32 -> vector<8x128xf32>
    %78 = arith.mulf %77, %60 : vector<8x128xf32>
    %79 = arith.addf %78, %76 : vector<8x128xf32>
    %c32_i32_23 = arith.constant 32 : i32
    %80 = tpu.dynamic_rotate %74 by %c32_i32_23 dim 1 : vector<8x128xf32>, i32 -> vector<8x128xf32>
    %81 = math.tanh %79 : vector<8x128xf32>
    %82 = arith.mulf %80, %81 : vector<8x128xf32>
    %83 = vector.extract_strided_slice %5 {offsets = [32, 0], sizes = [8, 128], strides = [1, 1]} : vector<64x128xf32> to vector<8x128xf32>
    %84 = arith.truncf %82 : vector<8x128xf32> to vector<8x128xbf16>
    %cst_24 = arith.constant dense<0.000000e+00> : vector<8x128xf32>
    %85 = tpu.matmul %84, %12, %cst_24 {dimension_numbers = #tpu.dot_dimension_numbers<[1], [0], [0], [1], [0, 0, 1, 1], [], []>} : vector<8x128xbf16>, vector<128x128xbf16>, vector<8x128xf32> -> vector<8x128xf32>
    %86 = arith.addf %83, %85 : vector<8x128xf32>
    %87 = math.tanh %86 : vector<8x128xf32>
    %88 = arith.negf %86 : vector<8x128xf32>
    %89 = math.exp %88 : vector<8x128xf32>
    %cst_25 = arith.constant 1.000000e+00 : f32
    %90 = vector.broadcast %cst_25 : f32 to vector<8x128xf32>
    %91 = arith.addf %90, %89 : vector<8x128xf32>
    %92 = arith.divf %90, %91 : vector<8x128xf32>
    %93 = arith.select %11, %87, %92 : vector<8x128xi1>, vector<8x128xf32>
    %c64_i32_26 = arith.constant 64 : i32
    %94 = tpu.dynamic_rotate %93 by %c64_i32_26 dim 1 : vector<8x128xf32>, i32 -> vector<8x128xf32>
    %95 = arith.mulf %93, %94 : vector<8x128xf32>
    %c96_i32_27 = arith.constant 96 : i32
    %96 = tpu.dynamic_rotate %93 by %c96_i32_27 dim 1 : vector<8x128xf32>, i32 -> vector<8x128xf32>
    %97 = arith.mulf %96, %79 : vector<8x128xf32>
    %98 = arith.addf %97, %95 : vector<8x128xf32>
    %c32_i32_28 = arith.constant 32 : i32
    %99 = tpu.dynamic_rotate %93 by %c32_i32_28 dim 1 : vector<8x128xf32>, i32 -> vector<8x128xf32>
    %100 = math.tanh %98 : vector<8x128xf32>
    %101 = arith.mulf %99, %100 : vector<8x128xf32>
    %102 = vector.extract_strided_slice %5 {offsets = [40, 0], sizes = [8, 128], strides = [1, 1]} : vector<64x128xf32> to vector<8x128xf32>
    %103 = arith.truncf %101 : vector<8x128xf32> to vector<8x128xbf16>
    %cst_29 = arith.constant dense<0.000000e+00> : vector<8x128xf32>
    %104 = tpu.matmul %103, %12, %cst_29 {dimension_numbers = #tpu.dot_dimension_numbers<[1], [0], [0], [1], [0, 0, 1, 1], [], []>} : vector<8x128xbf16>, vector<128x128xbf16>, vector<8x128xf32> -> vector<8x128xf32>
    %105 = arith.addf %102, %104 : vector<8x128xf32>
    %106 = math.tanh %105 : vector<8x128xf32>
    %107 = arith.negf %105 : vector<8x128xf32>
    %108 = math.exp %107 : vector<8x128xf32>
    %cst_30 = arith.constant 1.000000e+00 : f32
    %109 = vector.broadcast %cst_30 : f32 to vector<8x128xf32>
    %110 = arith.addf %109, %108 : vector<8x128xf32>
    %111 = arith.divf %109, %110 : vector<8x128xf32>
    %112 = arith.select %11, %106, %111 : vector<8x128xi1>, vector<8x128xf32>
    %c64_i32_31 = arith.constant 64 : i32
    %113 = tpu.dynamic_rotate %112 by %c64_i32_31 dim 1 : vector<8x128xf32>, i32 -> vector<8x128xf32>
    %114 = arith.mulf %112, %113 : vector<8x128xf32>
    %c96_i32_32 = arith.constant 96 : i32
    %115 = tpu.dynamic_rotate %112 by %c96_i32_32 dim 1 : vector<8x128xf32>, i32 -> vector<8x128xf32>
    %116 = arith.mulf %115, %98 : vector<8x128xf32>
    %117 = arith.addf %116, %114 : vector<8x128xf32>
    %c32_i32_33 = arith.constant 32 : i32
    %118 = tpu.dynamic_rotate %112 by %c32_i32_33 dim 1 : vector<8x128xf32>, i32 -> vector<8x128xf32>
    %119 = math.tanh %117 : vector<8x128xf32>
    %120 = arith.mulf %118, %119 : vector<8x128xf32>
    %121 = vector.extract_strided_slice %5 {offsets = [48, 0], sizes = [8, 128], strides = [1, 1]} : vector<64x128xf32> to vector<8x128xf32>
    %122 = arith.truncf %120 : vector<8x128xf32> to vector<8x128xbf16>
    %cst_34 = arith.constant dense<0.000000e+00> : vector<8x128xf32>
    %123 = tpu.matmul %122, %12, %cst_34 {dimension_numbers = #tpu.dot_dimension_numbers<[1], [0], [0], [1], [0, 0, 1, 1], [], []>} : vector<8x128xbf16>, vector<128x128xbf16>, vector<8x128xf32> -> vector<8x128xf32>
    %124 = arith.addf %121, %123 : vector<8x128xf32>
    %125 = math.tanh %124 : vector<8x128xf32>
    %126 = arith.negf %124 : vector<8x128xf32>
    %127 = math.exp %126 : vector<8x128xf32>
    %cst_35 = arith.constant 1.000000e+00 : f32
    %128 = vector.broadcast %cst_35 : f32 to vector<8x128xf32>
    %129 = arith.addf %128, %127 : vector<8x128xf32>
    %130 = arith.divf %128, %129 : vector<8x128xf32>
    %131 = arith.select %11, %125, %130 : vector<8x128xi1>, vector<8x128xf32>
    %c64_i32_36 = arith.constant 64 : i32
    %132 = tpu.dynamic_rotate %131 by %c64_i32_36 dim 1 : vector<8x128xf32>, i32 -> vector<8x128xf32>
    %133 = arith.mulf %131, %132 : vector<8x128xf32>
    %c96_i32_37 = arith.constant 96 : i32
    %134 = tpu.dynamic_rotate %131 by %c96_i32_37 dim 1 : vector<8x128xf32>, i32 -> vector<8x128xf32>
    %135 = arith.mulf %134, %117 : vector<8x128xf32>
    %136 = arith.addf %135, %133 : vector<8x128xf32>
    %c32_i32_38 = arith.constant 32 : i32
    %137 = tpu.dynamic_rotate %131 by %c32_i32_38 dim 1 : vector<8x128xf32>, i32 -> vector<8x128xf32>
    %138 = math.tanh %136 : vector<8x128xf32>
    %139 = arith.mulf %137, %138 : vector<8x128xf32>
    %140 = vector.extract_strided_slice %5 {offsets = [56, 0], sizes = [8, 128], strides = [1, 1]} : vector<64x128xf32> to vector<8x128xf32>
    %141 = arith.truncf %139 : vector<8x128xf32> to vector<8x128xbf16>
    %cst_39 = arith.constant dense<0.000000e+00> : vector<8x128xf32>
    %142 = tpu.matmul %141, %12, %cst_39 {dimension_numbers = #tpu.dot_dimension_numbers<[1], [0], [0], [1], [0, 0, 1, 1], [], []>} : vector<8x128xbf16>, vector<128x128xbf16>, vector<8x128xf32> -> vector<8x128xf32>
    %143 = arith.addf %140, %142 : vector<8x128xf32>
    %144 = math.tanh %143 : vector<8x128xf32>
    %145 = arith.negf %143 : vector<8x128xf32>
    %146 = math.exp %145 : vector<8x128xf32>
    %cst_40 = arith.constant 1.000000e+00 : f32
    %147 = vector.broadcast %cst_40 : f32 to vector<8x128xf32>
    %148 = arith.addf %147, %146 : vector<8x128xf32>
    %149 = arith.divf %147, %148 : vector<8x128xf32>
    %150 = arith.select %11, %144, %149 : vector<8x128xi1>, vector<8x128xf32>
    %c64_i32_41 = arith.constant 64 : i32
    %151 = tpu.dynamic_rotate %150 by %c64_i32_41 dim 1 : vector<8x128xf32>, i32 -> vector<8x128xf32>
    %152 = arith.mulf %150, %151 : vector<8x128xf32>
    %c96_i32_42 = arith.constant 96 : i32
    %153 = tpu.dynamic_rotate %150 by %c96_i32_42 dim 1 : vector<8x128xf32>, i32 -> vector<8x128xf32>
    %154 = arith.mulf %153, %136 : vector<8x128xf32>
    %155 = arith.addf %154, %152 : vector<8x128xf32>
    %c32_i32_43 = arith.constant 32 : i32
    %156 = tpu.dynamic_rotate %150 by %c32_i32_43 dim 1 : vector<8x128xf32>, i32 -> vector<8x128xf32>
    %157 = math.tanh %155 : vector<8x128xf32>
    %158 = arith.mulf %156, %157 : vector<8x128xf32>
    %c0_44 = arith.constant 0 : index
    %c0_45 = arith.constant 0 : index
    %159 = vector.load %arg4[%c0_44, %c0_45] : memref<128x4xf32, #tpu.memory_space<vmem>>, vector<128x4xf32>
    %cst_46 = arith.constant dense<0.000000e+00> : vector<8x4xf32>
    %160 = tpu.matmul %158, %159, %cst_46 {dimension_numbers = #tpu.dot_dimension_numbers<[1], [0], [0], [1], [0, 0, 1, 1], [], []>} : vector<8x128xf32>, vector<128x4xf32>, vector<8x4xf32> -> vector<8x4xf32>
    %c0_47 = arith.constant 0 : index
    %c0_48 = arith.constant 0 : index
    %161 = vector.load %arg5[%c0_47, %c0_48] : memref<1x4xf32, #tpu.memory_space<vmem>>, vector<1x4xf32>
    %162 = vector.broadcast %161 : vector<1x4xf32> to vector<8x4xf32>
    %163 = arith.addf %160, %162 : vector<8x4xf32>
    %c0_49 = arith.constant 0 : index
    %c0_50 = arith.constant 0 : index
    %164 = vector.load %arg6[%c0_49, %c0_50] : memref<8x4xf32, #tpu.memory_space<vmem>>, vector<8x4xf32>
    tpu.vector_store %arg6[%c0_49, %c0_50], %163 {strides = array<i32>} : memref<8x4xf32, #tpu.memory_space<vmem>>, vector<8x4xf32>,
    return
  }
}

</mosaic_0001>

<bundles_post_ra>
// kernel: lstm_classifier_forward.1
= control target key start
LH: loop header
LB: loop body
LE: loop exit
PB: predicated region body
PF: predicated region fallthrough
CT: control target
= control target key end

     0   :  { %vm43_vm0 = vcmask 261120   ;;  %v1206_v8 = vmov 0.0   ;;  %v173_v19 = vlaneseq  ;;  %s1207_s25 = smov 64   ;;  %vm1208_vm4 = vmmov 0   ;;  %s1209_s26 = smov 32   ;;  %s1588_s1 = inlined_call_operand.vmem [shape: f32[32,128], index: 1, kind: input, shape index: {}]   ;;  %s1589_s0 = inlined_call_operand.vmem [shape: f32[64,32], index: 0, kind: input, shape index: {}]   ;;  %s1590_s3 = inlined_call_operand.vmem [shape: bf16[128,128], index: 3, kind: input, shape index: {}]   ;;  %s1591_s2 = inlined_call_operand.vmem [shape: f32[1,128], index: 2, kind: input, shape index: {}]   ;;  %s1592_s4 = inlined_call_operand.vmem [shape: f32[128,4], index: 4, kind: input, shape index: {}]   ;;  %s1593_s5 = inlined_call_operand.vmem [shape: f32[1,4], index: 5, kind: input, shape index: {}]   ;;  %s1594_s6 = inlined_call_operand.vmem [shape: f32[8,4], index: 6, kind: output, shape index: {}]  }
   0x1   :  { %v32_v0 = vld [vmem:[%s1588_s1] sm:$0xff]  ;;  %v33_v1 = vld [vmem:[%s1588_s1 + $0x8] sm:$0xff]  ;;  %v34_v2 = vld [vmem:[%s1588_s1 + $0x10] sm:$0xff]  ;;  %921 = vmatprep.subr.bf16.mxu1 %v1206_v8  ;;  %937 = vmatprep.mubr.msk.bf16.mxu1 %vm1208_vm4, %v1206_v8  ;;  %s1210_s13 = smov 96   ;;  %vm777_vm5 = vcmask 31744  }
   0x2   :  { %v1096_v3 = vpack.c.bf16 %v33_v1, %v32_v0  ;;  %v35_v4 = vld [vmem:[%s1588_s1 + $0x18] sm:$0xff]  ;;  %v24_v5 = vld [vmem:[%s1589_s0] sm:$0xff]  ;;  %v25_v7 = vld [vmem:[%s1589_s0 + $0x8] sm:$0xff]  ;;  %v174_v22 = vand.u32 127, %v173_v19 }
   0x3   :  { %v1100_v6 = vpack.c.bf16 %v35_v4, %v34_v2  ;;  %909 = vmatprep.mubr.msk.f32.mxu0 %vm43_vm0, %v24_v5  ;;  %v1271_v9 = vld [vmem:[%s1590_s3] sm:$0xff]   ;;  %v1278_v10 = vld [vmem:[%s1590_s3 + $0x8] sm:$0xff]   ;;  %v1287_v11 = vld [vmem:[%s1590_s3 + $0x10] sm:$0xff]  }
   0x4   :  { %1097 = vmatprep.subr.bf16.mxu0 %v1096_v3  ;;  %922 = vmatpush3.bf16.msra.mxu1 %v1271_v9  ;;  %v1296_v12 = vld [vmem:[%s1590_s3 + $0x18] sm:$0xff]   ;;  %v1308_v13 = vld [vmem:[%s1591_s2] ss:$0 sm:$0xff]  ;;  %v1325_v23 = vld [vmem:[%s1590_s3 + $0x28] sm:$0xff]   ;;  %vm175_vm1 = vcmp.ge.s32.totalorder %v174_v22, 64  ;;  %vm176_vm2 = vcmp.lt.s32.totalorder %v174_v22, 96 }
   0x5   :  { %1099 = vmatpush3.bf16.msra.mxu0 %v1096_v3  ;;  %923 = vmatprep.subr.bf16.mxu1 %v1206_v8  ;;  %v1316_v21 = vld [vmem:[%s1590_s3 + $0x20] sm:$0xff]   ;;  %v1334_v24 = vld [vmem:[%s1590_s3 + $0x30] sm:$0xff]   ;;  %vm1336_vm3 = vmand %vm175_vm1, %vm176_vm2 }
   0x6   :  { %1101 = vmatprep.subr.bf16.mxu0 %v1100_v6  ;;  %v1349_v29 = vld [vmem:[%s1590_s3 + $0x38] sm:$0xff]   ;;  %v26_v45 = vld [vmem:[%s1589_s0 + $0x10] sm:$0xff]  ;;  %v28_v47 = vld [vmem:[%s1589_s0 + $0x20] sm:$0xff] }
   0x7   :  { %v27_v46 = vld [vmem:[%s1589_s0 + $0x18] sm:$0xff]  ;;  %v29_v50 = vld [vmem:[%s1589_s0 + $0x28] sm:$0xff]  ;;  %v30_v52 = vld [vmem:[%s1589_s0 + $0x30] sm:$0xff] }
   0x8   :  { %924 = vmatpush3.bf16.msra.mxu1 %v1278_v10  ;;  %v31_v53 = vld [vmem:[%s1589_s0 + $0x38] sm:$0xff]  ;;  %v808_v25 = vld [vmem:[%s1593_s5] ss:$0 sm:$0xff] }
   0x9   :  { %1103 = vmatpush3.bf16.msra.mxu0 %v1100_v6  ;;  %925 = vmatprep.subr.bf16.mxu1 %v1206_v8 }
   0xa   :  { %941 = vmatprep.subr.bf16.mxu0 %v1206_v8 }
   0xc   :  { %910 = vmatmul.mubr.msk.f32.vlgmr.msra.gmra.mrb[0].mxu0 %vm43_vm0, %v25_v7  ;;  %926 = vmatpush3.bf16.msra.mxu1 %v1287_v11 }
   0xd   :  { %942 = vmatpush3.bf16.msra.mxu0 %v1271_v9  ;;  %927 = vmatprep.subr.bf16.mxu1 %v1206_v8 }
   0xe   :  { %943 = vmatprep.subr.bf16.mxu0 %v1206_v8  ;;  %912 = vmatprep.mubr.msk.f32.mxu0 %vm43_vm0, %v26_v45 }
  0x10   :  { %928 = vmatpush3.bf16.msra.mxu1 %v1296_v12  ;;  %913 = vmatmul.mubr.msk.f32.gmra.mrb[2].mxu0 %vm43_vm0, %v27_v46 }
  0x11   :  { %944 = vmatpush3.bf16.msra.mxu0 %v1278_v10  ;;  %929 = vmatprep.subr.bf16.mxu1 %v1206_v8 }
  0x12   :  { %945 = vmatprep.subr.bf16.mxu0 %v1206_v8  ;;  %915 = vmatprep.mubr.msk.f32.mxu0 %vm43_vm0, %v28_v47 }
  0x14   :  { %930 = vmatpush3.bf16.msra.mxu1 %v1316_v21  ;;  %916 = vmatmul.mubr.msk.f32.gmra.mrb[4].mxu0 %vm43_vm0, %v29_v50 }
  0x15   :  { %946 = vmatpush3.bf16.msra.mxu0 %v1287_v11  ;;  %931 = vmatprep.subr.bf16.mxu1 %v1206_v8 }
  0x16   :  { %947 = vmatprep.subr.bf16.mxu0 %v1206_v8  ;;  %918 = vmatprep.mubr.msk.f32.mxu0 %vm43_vm0, %v30_v52 }
  0x18   :  { %932 = vmatpush3.bf16.msra.mxu1 %v1325_v23  ;;  %919 = vmatmul.mubr.msk.f32.gmra.mrb[6].mxu0 %vm43_vm0, %v31_v53 }
  0x19   :  { %948 = vmatpush3.bf16.msra.mxu0 %v1296_v12  ;;  %933 = vmatprep.subr.bf16.mxu1 %v1206_v8 }
  0x1a   :  { %949 = vmatprep.subr.bf16.mxu0 %v1206_v8  ;;  %957 = vmatprep.mubr.msk.bf16.mxu0 %vm1208_vm4, %v1206_v8 }
  0x1c   :  { %934 = vmatpush3.bf16.msra.mxu1 %v1334_v24 }
  0x1d   :  { %950 = vmatpush3.bf16.msra.mxu0 %v1316_v21  ;;  %935 = vmatprep.subr.bf16.mxu1 %v1206_v8 }
  0x1e   :  { %951 = vmatprep.subr.bf16.mxu0 %v1206_v8 }
  0x20   :  { %936 = vmatpush3.bf16.msra.mxu1 %v1349_v29 }
  0x21   :  { %952 = vmatpush3.bf16.msra.mxu0 %v1325_v23  ;;  %961 = vmatprep.subr.bf16.mxu1 %v1206_v8 }
  0x22   :  { %953 = vmatprep.subr.bf16.mxu0 %v1206_v8 }
  0x25   :  { %954 = vmatpush3.bf16.msra.mxu0 %v1334_v24 }
  0x26   :  { %955 = vmatprep.subr.bf16.mxu0 %v1206_v8 }
  0x29   :  { %956 = vmatpush3.bf16.msra.mxu0 %v1349_v29 }
  0x2a   :  { %981 = vmatprep.subr.bf16.mxu0 %v1206_v8 }
  0xdf   :  { %v1310_v14 = vpop.f32.mrb[0].mxu0 }
  0xe0   :  { %v134_v15 = vpop.f32.mrb[1].mxu0  ;;  %v140_v36 = vadd.f32 %v1310_v14, %v1308_v13 }
  0xe1   :  { %v135_v16 = vadd.f32 %v1308_v13, %v134_v15 }
  0xe3   :  { %v792_v17 = vmul.f32 -1.442695, %v135_v16  ;;  %v914_v63 = vpop.f32.mrb[2].mxu0 }
  0xe4   :  { %v144_v0 = vpop.f32.mrb[3].mxu0 }
  0xe5   :  { %1142 = vpow2.f32 %v792_v17  ;;  %v145_v5 = vadd.f32 %v1308_v13, %v144_v0 }
  0xe6   :  { %1144 = vtanh.f32 %v135_v16 }
  0xe7   :  { %v1428_v1 = vpop.f32.mrb[4].mxu0 }
  0xe8   :  { %v1430_v2 = vpop.f32.mrb[5].mxu0 }
  0xeb   :  { %v1432_v3 = vpop.f32.mrb[6].mxu0 }
  0xec   :  { %v1434_v4 = vpop.f32.mrb[7].mxu0 }
  0xef   :  { %v1143_v18 = vpop.eup %1142 }
  0xf0   :  { %v198_v20 = vadd.f32 1.0, %v1143_v18  ;;  %v1145_v26 = vpop.eup %1144 }
  0xf2   :  { %1146 = vrcp.f32 %v198_v20 }
  0xfc   :  { %v1147_v27 = vpop.eup %1146 }
  0xfd   :  { %v201_v28 = vsel %vm1336_vm3, %v1145_v26, %v1147_v27 }
  0xfe   :  { %202 = vrot.lane.b32.xlu0 %v201_v28, %s1207_s25 }
 0x102   :  { %205 = vrot.lane.b32.xlu0 %v201_v28, %s1209_s26 }
 0x170   :  { %v203_v30 = vpop.permute.xlu0 %202 }
 0x171   :  { %v204_v31 = vmul.f32 %v203_v30, %v201_v28 }
 0x173   :  { %1148 = vtanh.f32 %v204_v31 }
 0x174   :  { %v206_v33 = vpop.permute.xlu0 %205 }
 0x17d   :  { %v1149_v32 = vpop.eup %1148 }
 0x17e   :  { %v208_v34 = vmul.f32 %v1149_v32, %v206_v33 }
 0x180   :  { %v209_v35 = vpack.c.bf16 %v208_v34, %v208_v34 }
 0x182   :  { %938 = vmatmul.mubr.bf16.vlgmr.msra.gmra.mrb[0].mxu1 %v209_v35 }
 0x183   :  { %962 = vmatpush3.bf16.msra.mxu1 %v1271_v9  ;;  %977 = vmatprep.mubr.msk.bf16.mxu1 %vm1208_vm4, %v1206_v8 }
 0x184   :  { %963 = vmatprep.subr.bf16.mxu1 %v1206_v8 }
 0x187   :  { %964 = vmatpush3.bf16.msra.mxu1 %v1278_v10 }
 0x188   :  { %965 = vmatprep.subr.bf16.mxu1 %v1206_v8 }
 0x18b   :  { %966 = vmatpush3.bf16.msra.mxu1 %v1287_v11 }
 0x18c   :  { %967 = vmatprep.subr.bf16.mxu1 %v1206_v8 }
 0x18f   :  { %968 = vmatpush3.bf16.msra.mxu1 %v1296_v12 }
 0x190   :  { %969 = vmatprep.subr.bf16.mxu1 %v1206_v8 }
 0x193   :  { %970 = vmatpush3.bf16.msra.mxu1 %v1316_v21 }
 0x194   :  { %971 = vmatprep.subr.bf16.mxu1 %v1206_v8 }
 0x197   :  { %972 = vmatpush3.bf16.msra.mxu1 %v1325_v23 }
 0x198   :  { %973 = vmatprep.subr.bf16.mxu1 %v1206_v8 }
 0x19b   :  { %974 = vmatpush3.bf16.msra.mxu1 %v1334_v24 }
 0x19c   :  { %975 = vmatprep.subr.bf16.mxu1 %v1206_v8 }
 0x19f   :  { %976 = vmatpush3.bf16.msra.mxu1 %v1349_v29 }
 0x1a0   :  { %1001 = vmatprep.subr.bf16.mxu1 %v1206_v8 }
 0x255   :  { %v292_v37 = vpop.f32.mrb[0].mxu1 }
 0x256   :  { %v298_v38 = vadd.f32 %v292_v37, %v140_v36  ;;  %v939_v39 = vpop.f32.mrb[1].mxu1  ;;  %v150_v37 = vadd.f32 %v914_v63, %v1308_v13 }
 0x257   :  { %v295_v40 = vpop.f32.mrb[2].mxu1 }
 0x258   :  { %v801_v41 = vmul.f32 -1.442695, %v298_v38  ;;  %v940_v42 = vpop.f32.mrb[3].mxu1 }
 0x25a   :  { %1150 = vpow2.f32 %v801_v41 }
 0x25b   :  { %1152 = vtanh.f32 %v298_v38 }
 0x264   :  { %v1151_v43 = vpop.eup %1150 }
 0x265   :  { %v303_v44 = vadd.f32 1.0, %v1151_v43  ;;  %v1153_v48 = vpop.eup %1152 }
 0x267   :  { %1154 = vrcp.f32 %v303_v44 }
 0x271   :  { %v1155_v49 = vpop.eup %1154 }
 0x272   :  { %v306_v51 = vsel %vm1336_vm3, %v1153_v48, %v1155_v49 }
 0x273   :  { %314 = vrot.lane.b32.xlu0 %v306_v51, %s1209_s26  ;;  %307 = vrot.lane.b32.xlu1 %v306_v51, %s1207_s25 }
 0x277   :  { %310 = vrot.lane.b32.xlu1 %v306_v51, %s1210_s13 }
 0x2e5   :  { %v308_v54 = vpop.permute.xlu1 %307  ;;  %v315_v60 = vpop.permute.xlu0 %314 }
 0x2e6   :  { %v309_v56 = vmul.f32 %v308_v54, %v306_v51 }
 0x2e9   :  { %v311_v55 = vpop.permute.xlu1 %310 }
 0x2ea   :  { %v312_v57 = vmul.f32 %v311_v55, %v204_v31 }
 0x2ec   :  { %v313_v58 = vadd.f32 %v312_v57, %v309_v56 }
 0x2ee   :  { %1156 = vtanh.f32 %v313_v58 }
 0x2f8   :  { %v1157_v59 = vpop.eup %1156 }
 0x2f9   :  { %v317_v61 = vmul.f32 %v1157_v59, %v315_v60 }
 0x2fb   :  { %v318_v62 = vpack.c.bf16 %v317_v61, %v317_v61 }
 0x2fd   :  { %958 = vmatmul.mubr.bf16.vlgmr.msra.gmra.mrb[8].mxu0 %v318_v62 }
 0x2fe   :  { %982 = vmatpush3.bf16.msra.mxu0 %v1271_v9  ;;  %997 = vmatprep.mubr.msk.bf16.mxu0 %vm1208_vm4, %v1206_v8 }
 0x2ff   :  { %983 = vmatprep.subr.bf16.mxu0 %v1206_v8 }
 0x302   :  { %984 = vmatpush3.bf16.msra.mxu0 %v1278_v10 }
 0x303   :  { %985 = vmatprep.subr.bf16.mxu0 %v1206_v8 }
 0x306   :  { %986 = vmatpush3.bf16.msra.mxu0 %v1287_v11 }
 0x307   :  { %987 = vmatprep.subr.bf16.mxu0 %v1206_v8 }
 0x30a   :  { %988 = vmatpush3.bf16.msra.mxu0 %v1296_v12 }
 0x30b   :  { %989 = vmatprep.subr.bf16.mxu0 %v1206_v8 }
 0x30e   :  { %990 = vmatpush3.bf16.msra.mxu0 %v1316_v21 }
 0x30f   :  { %991 = vmatprep.subr.bf16.mxu0 %v1206_v8 }
 0x312   :  { %992 = vmatpush3.bf16.msra.mxu0 %v1325_v23 }
 0x313   :  { %993 = vmatprep.subr.bf16.mxu0 %v1206_v8 }
 0x316   :  { %994 = vmatpush3.bf16.msra.mxu0 %v1334_v24 }
 0x317   :  { %995 = vmatprep.subr.bf16.mxu0 %v1206_v8 }
 0x31a   :  { %996 = vmatpush3.bf16.msra.mxu0 %v1349_v29 }
 0x31b   :  { %1021 = vmatprep.subr.bf16.mxu0 %v1206_v8 }
 0x3d0   :  { %v353_v6 = vpop.f32.mrb[8].mxu0 }
 0x3d1   :  { %v359_v7 = vadd.f32 %v353_v6, %v145_v5  ;;  %v959_v14 = vpop.f32.mrb[9].mxu0 }
 0x3d2   :  { %v356_v15 = vpop.f32.mrb[10].mxu0 }
 0x3d3   :  { %v802_v16 = vmul.f32 -1.442695, %v359_v7  ;;  %v960_v17 = vpop.f32.mrb[11].mxu0 }
 0x3d5   :  { %1158 = vpow2.f32 %v802_v16 }
 0x3d6   :  { %1160 = vtanh.f32 %v359_v7 }
 0x3df   :  { %v1159_v18 = vpop.eup %1158 }
 0x3e0   :  { %v364_v19 = vadd.f32 1.0, %v1159_v18  ;;  %v1161_v20 = vpop.eup %1160 }
 0x3e2   :  { %1162 = vrcp.f32 %v364_v19 }
 0x3ec   :  { %v1163_v22 = vpop.eup %1162 }
 0x3ed   :  { %v367_v26 = vsel %vm1336_vm3, %v1161_v20, %v1163_v22 }
 0x3ee   :  { %371 = vrot.lane.b32.xlu0 %v367_v26, %s1210_s13  ;;  %368 = vrot.lane.b32.xlu1 %v367_v26, %s1207_s25 }
 0x3f2   :  { %375 = vrot.lane.b32.xlu1 %v367_v26, %s1209_s26 }
 0x460   :  { %v372_v27 = vpop.permute.xlu0 %371  ;;  %v369_v28 = vpop.permute.xlu1 %368 }
 0x461   :  { %v373_v30 = vmul.f32 %v372_v27, %v313_v58  ;;  %v370_v31 = vmul.f32 %v369_v28, %v367_v26  ;;  %v155_v58 = vadd.f32 %v1308_v13, %v1430_v2 }
 0x463   :  { %v374_v32 = vadd.f32 %v373_v30, %v370_v31 }
 0x464   :  { %v376_v34 = vpop.permute.xlu1 %375 }
 0x465   :  { %1164 = vtanh.f32 %v374_v32 }
 0x46f   :  { %v1165_v33 = vpop.eup %1164 }
 0x470   :  { %v378_v35 = vmul.f32 %v1165_v33, %v376_v34 }
 0x472   :  { %v379_v36 = vpack.c.bf16 %v378_v35, %v378_v35 }
 0x474   :  { %978 = vmatmul.mubr.bf16.vlgmr.msra.gmra.mrb[4].mxu1 %v379_v36 }
 0x475   :  { %1002 = vmatpush3.bf16.msra.mxu1 %v1271_v9  ;;  %1017 = vmatprep.mubr.msk.bf16.mxu1 %vm1208_vm4, %v1206_v8 }
 0x476   :  { %1003 = vmatprep.subr.bf16.mxu1 %v1206_v8 }
 0x479   :  { %1004 = vmatpush3.bf16.msra.mxu1 %v1278_v10 }
 0x47a   :  { %1005 = vmatprep.subr.bf16.mxu1 %v1206_v8 }
 0x47d   :  { %1006 = vmatpush3.bf16.msra.mxu1 %v1287_v11 }
 0x47e   :  { %1007 = vmatprep.subr.bf16.mxu1 %v1206_v8 }
 0x481   :  { %1008 = vmatpush3.bf16.msra.mxu1 %v1296_v12 }
 0x482   :  { %1009 = vmatprep.subr.bf16.mxu1 %v1206_v8 }
 0x485   :  { %1010 = vmatpush3.bf16.msra.mxu1 %v1316_v21 }
 0x486   :  { %1011 = vmatprep.subr.bf16.mxu1 %v1206_v8 }
 0x489   :  { %1012 = vmatpush3.bf16.msra.mxu1 %v1325_v23 }
 0x48a   :  { %1013 = vmatprep.subr.bf16.mxu1 %v1206_v8 }
 0x48d   :  { %1014 = vmatpush3.bf16.msra.mxu1 %v1334_v24 }
 0x48e   :  { %1015 = vmatprep.subr.bf16.mxu1 %v1206_v8 }
 0x491   :  { %1016 = vmatpush3.bf16.msra.mxu1 %v1349_v29 }
 0x492   :  { %1041 = vmatprep.subr.bf16.mxu1 %v1206_v8 }
 0x547   :  { %v414_v38 = vpop.f32.mrb[4].mxu1 }
 0x548   :  { %v420_v39 = vadd.f32 %v414_v38, %v150_v37  ;;  %v979_v40 = vpop.f32.mrb[5].mxu1 }
 0x549   :  { %v417_v41 = vpop.f32.mrb[6].mxu1 }
 0x54a   :  { %v803_v42 = vmul.f32 -1.442695, %v420_v39  ;;  %v980_v43 = vpop.f32.mrb[7].mxu1  ;;  %v165_v41 = vadd.f32 %v1308_v13, %v1434_v4 }
 0x54c   :  { %1166 = vpow2.f32 %v803_v42 }
 0x54d   :  { %1168 = vtanh.f32 %v420_v39 }
 0x556   :  { %v1167_v44 = vpop.eup %1166 }
 0x557   :  { %v425_v45 = vadd.f32 1.0, %v1167_v44  ;;  %v1169_v46 = vpop.eup %1168 }
 0x559   :  { %1170 = vrcp.f32 %v425_v45 }
 0x563   :  { %v1171_v47 = vpop.eup %1170 }
 0x564   :  { %v428_v48 = vsel %vm1336_vm3, %v1169_v46, %v1171_v47 }
 0x565   :  { %432 = vrot.lane.b32.xlu1 %v428_v48, %s1210_s13  ;;  %429 = vrot.lane.b32.xlu0 %v428_v48, %s1207_s25 }
 0x569   :  { %436 = vrot.lane.b32.xlu0 %v428_v48, %s1209_s26 }
 0x5d7   :  { %v433_v49 = vpop.permute.xlu1 %432  ;;  %v430_v50 = vpop.permute.xlu0 %429 }
 0x5d8   :  { %v434_v51 = vmul.f32 %v433_v49, %v374_v32  ;;  %v431_v52 = vmul.f32 %v430_v50, %v428_v48 }
 0x5da   :  { %v435_v53 = vadd.f32 %v434_v51, %v431_v52 }
 0x5db   :  { %v437_v55 = vpop.permute.xlu0 %436 }
 0x5dc   :  { %1172 = vtanh.f32 %v435_v53 }
 0x5e6   :  { %v1173_v54 = vpop.eup %1172 }
 0x5e7   :  { %v439_v56 = vmul.f32 %v1173_v54, %v437_v55 }
 0x5e9   :  { %v440_v57 = vpack.c.bf16 %v439_v56, %v439_v56 }
 0x5eb   :  { %998 = vmatmul.mubr.bf16.vlgmr.msra.gmra.mrb[12].mxu0 %v440_v57 }
 0x5ec   :  { %1022 = vmatpush3.bf16.msra.mxu0 %v1271_v9  ;;  %1037 = vmatprep.mubr.msk.bf16.mxu0 %vm1208_vm4, %v1206_v8 }
 0x5ed   :  { %1023 = vmatprep.subr.bf16.mxu0 %v1206_v8 }
 0x5f0   :  { %1024 = vmatpush3.bf16.msra.mxu0 %v1278_v10 }
 0x5f1   :  { %1025 = vmatprep.subr.bf16.mxu0 %v1206_v8 }
 0x5f4   :  { %1026 = vmatpush3.bf16.msra.mxu0 %v1287_v11 }
 0x5f5   :  { %1027 = vmatprep.subr.bf16.mxu0 %v1206_v8 }
 0x5f8   :  { %1028 = vmatpush3.bf16.msra.mxu0 %v1296_v12 }
 0x5f9   :  { %1029 = vmatprep.subr.bf16.mxu0 %v1206_v8 }
 0x5fc   :  { %1030 = vmatpush3.bf16.msra.mxu0 %v1316_v21 }
 0x5fd   :  { %1031 = vmatprep.subr.bf16.mxu0 %v1206_v8 }
 0x600   :  { %1032 = vmatpush3.bf16.msra.mxu0 %v1325_v23 }
 0x601   :  { %1033 = vmatprep.subr.bf16.mxu0 %v1206_v8 }
 0x604   :  { %1034 = vmatpush3.bf16.msra.mxu0 %v1334_v24 }
 0x605   :  { %1035 = vmatprep.subr.bf16.mxu0 %v1206_v8 }
 0x608   :  { %1036 = vmatpush3.bf16.msra.mxu0 %v1349_v29 }
 0x6be   :  { %v475_v59 = vpop.f32.mrb[12].mxu0 }
 0x6bf   :  { %v481_v60 = vadd.f32 %v475_v59, %v155_v58  ;;  %v999_v61 = vpop.f32.mrb[13].mxu0 }
 0x6c0   :  { %v478_v62 = vpop.f32.mrb[14].mxu0  ;;  %v684_v61 = vld [vmem:[%s1592_s4] sm:$0xff] }
 0x6c1   :  { %v804_v63 = vmul.f32 -1.442695, %v481_v60  ;;  %v1000_v0 = vpop.f32.mrb[15].mxu0  ;;  %v685_v62 = vld [vmem:[%s1592_s4 + $0x8] sm:$0xff] }
 0x6c2   :  { %v1105_v0 = vpack.c.bf16 %v685_v62, %v684_v61 }
 0x6c3   :  { %1174 = vpow2.f32 %v804_v63  ;;  %v686_v63 = vld [vmem:[%s1592_s4 + $0x10] sm:$0xff] }
 0x6c4   :  { %1176 = vtanh.f32 %v481_v60  ;;  %v1211_v60 = vmov 0.0|0.0  }
 0x6c5   :  { %1104 = vmatprep.subr.bf16.mxu0 %v1211_v60 }
 0x6cd   :  { %v1175_v5 = vpop.eup %1174 }
 0x6ce   :  { %v486_v6 = vadd.f32 1.0, %v1175_v5  ;;  %v1177_v7 = vpop.eup %1176  ;;  %v687_v5 = vld [vmem:[%s1592_s4 + $0x18] sm:$0xff] }
 0x6d0   :  { %1178 = vrcp.f32 %v486_v6  ;;  %v1108_v6 = vpack.c.bf16 %v687_v5, %v686_v63 }
 0x6da   :  { %v1179_v14 = vpop.eup %1178 }
 0x6db   :  { %v489_v15 = vsel %vm1336_vm3, %v1177_v7, %v1179_v14  ;;  %v688_v7 = vld [vmem:[%s1592_s4 + $0x20] sm:$0xff]  ;;  %v689_v14 = vld [vmem:[%s1592_s4 + $0x28] sm:$0xff] }
 0x6dc   :  { %493 = vrot.lane.b32.xlu0 %v489_v15, %s1210_s13  ;;  %490 = vrot.lane.b32.xlu1 %v489_v15, %s1207_s25 }
 0x6e0   :  { %497 = vrot.lane.b32.xlu1 %v489_v15, %s1209_s26 }
 0x74e   :  { %v494_v2 = vpop.permute.xlu0 %493  ;;  %v491_v16 = vpop.permute.xlu1 %490 }
 0x74f   :  { %v495_v17 = vmul.f32 %v494_v2, %v435_v53  ;;  %v492_v18 = vmul.f32 %v491_v16, %v489_v15  ;;  %v1111_v15 = vpack.c.bf16 %v689_v14, %v688_v7  ;;  %v690_v2 = vld [vmem:[%s1592_s4 + $0x30] sm:$0xff]  ;;  %v691_v16 = vld [vmem:[%s1592_s4 + $0x38] sm:$0xff] }
 0x751   :  { %v496_v19 = vadd.f32 %v495_v17, %v492_v18  ;;  %v1114_v17 = vpack.c.bf16 %v691_v16, %v690_v2  ;;  %v170_v18 = vadd.f32 %v1432_v3, %v1308_v13  ;;  %v695_v3 = vld [vmem:[%s1592_s4 + $0x58] sm:$0xff] }
 0x752   :  { %v498_v22 = vpop.permute.xlu1 %497 }
 0x753   :  { %1180 = vtanh.f32 %v496_v19 }
 0x75d   :  { %v1181_v20 = vpop.eup %1180 }
 0x75e   :  { %v500_v26 = vmul.f32 %v1181_v20, %v498_v22 }
 0x760   :  { %v501_v27 = vpack.c.bf16 %v500_v26, %v500_v26 }
 0x762   :  { %1018 = vmatmul.mubr.bf16.vlgmr.msra.gmra.mrb[8].mxu1 %v501_v27 }
 0x763   :  { %1042 = vmatpush3.bf16.msra.mxu1 %v1271_v9  ;;  %1057 = vmatprep.mubr.msk.bf16.mxu1 %vm1208_vm4, %v1206_v8  ;;  %v160_v9 = vadd.f32 %v1428_v1, %v1308_v13  ;;  %v694_v13 = vld [vmem:[%s1592_s4 + $0x50] sm:$0xff] }
 0x764   :  { %1043 = vmatprep.subr.bf16.mxu1 %v1206_v8 }
 0x767   :  { %1044 = vmatpush3.bf16.msra.mxu1 %v1278_v10 }
 0x768   :  { %1045 = vmatprep.subr.bf16.mxu1 %v1206_v8 }
 0x76b   :  { %1046 = vmatpush3.bf16.msra.mxu1 %v1287_v11 }
 0x76c   :  { %1047 = vmatprep.subr.bf16.mxu1 %v1206_v8 }
 0x76f   :  { %1048 = vmatpush3.bf16.msra.mxu1 %v1296_v12 }
 0x770   :  { %1049 = vmatprep.subr.bf16.mxu1 %v1206_v8 }
 0x773   :  { %1050 = vmatpush3.bf16.msra.mxu1 %v1316_v21 }
 0x774   :  { %1051 = vmatprep.subr.bf16.mxu1 %v1206_v8 }
 0x777   :  { %1052 = vmatpush3.bf16.msra.mxu1 %v1325_v23 }
 0x778   :  { %1053 = vmatprep.subr.bf16.mxu1 %v1206_v8 }
 0x77b   :  { %1054 = vmatpush3.bf16.msra.mxu1 %v1334_v24 }
 0x77c   :  { %1055 = vmatprep.subr.bf16.mxu1 %v1206_v8 }
 0x77f   :  { %1056 = vmatpush3.bf16.msra.mxu1 %v1349_v29 }
 0x835   :  { %v536_v10 = vpop.f32.mrb[8].mxu1 }
 0x836   :  { %v542_v11 = vadd.f32 %v536_v10, %v160_v9  ;;  %v1019_v12 = vpop.f32.mrb[9].mxu1 }
 0x837   :  { %v539_v28 = vpop.f32.mrb[10].mxu1  ;;  %v692_v12 = vld [vmem:[%s1592_s4 + $0x40] sm:$0xff] }
 0x838   :  { %v805_v21 = vmul.f32 -1.442695, %v542_v11  ;;  %v1020_v30 = vpop.f32.mrb[11].mxu1  ;;  %v693_v28 = vld [vmem:[%s1592_s4 + $0x48] sm:$0xff] }
 0x839   :  { %v1120_v30 = vpack.c.bf16 %v695_v3, %v694_v13 }
 0x83a   :  { %1182 = vpow2.f32 %v805_v21  ;;  %v1117_v21 = vpack.c.bf16 %v693_v28, %v692_v12 }
 0x83b   :  { %1184 = vtanh.f32 %v542_v11 }
 0x844   :  { %v1183_v31 = vpop.eup %1182 }
 0x845   :  { %v547_v23 = vadd.f32 1.0, %v1183_v31  ;;  %v1185_v32 = vpop.eup %1184  ;;  %v696_v31 = vld [vmem:[%s1592_s4 + $0x60] sm:$0xff] }
 0x847   :  { %1186 = vrcp.f32 %v547_v23  ;;  %v697_v23 = vld [vmem:[%s1592_s4 + $0x68] sm:$0xff] }
 0x851   :  { %v1187_v24 = vpop.eup %1186 }
 0x852   :  { %v550_v33 = vsel %vm1336_vm3, %v1185_v32, %v1187_v24  ;;  %v1123_v32 = vpack.c.bf16 %v697_v23, %v696_v31 }
 0x853   :  { %554 = vrot.lane.b32.xlu1 %v550_v33, %s1210_s13  ;;  %551 = vrot.lane.b32.xlu0 %v550_v33, %s1207_s25 }
 0x857   :  { %558 = vrot.lane.b32.xlu0 %v550_v33, %s1209_s26 }
 0x8c5   :  { %v555_v29 = vpop.permute.xlu1 %554  ;;  %v552_v1 = vpop.permute.xlu0 %551 }
 0x8c6   :  { %v556_v34 = vmul.f32 %v555_v29, %v496_v19  ;;  %v553_v35 = vmul.f32 %v552_v1, %v550_v33  ;;  %v698_v29 = vld [vmem:[%s1592_s4 + $0x70] sm:$0xff]  ;;  %v699_v1 = vld [vmem:[%s1592_s4 + $0x78] sm:$0xff] }
 0x8c8   :  { %v557_v36 = vadd.f32 %v556_v34, %v553_v35  ;;  %v1126_v35 = vpack.c.bf16 %v699_v1, %v698_v29 }
 0x8c9   :  { %v559_v38 = vpop.permute.xlu0 %558 }
 0x8ca   :  { %1188 = vtanh.f32 %v557_v36 }
 0x8d4   :  { %v1189_v37 = vpop.eup %1188 }
 0x8d5   :  { %v561_v39 = vmul.f32 %v1189_v37, %v559_v38 }
 0x8d7   :  { %v562_v40 = vpack.c.bf16 %v561_v39, %v561_v39 }
 0x8d9   :  { %1038 = vmatmul.mubr.bf16.vlgmr.msra.gmra.mrb[16].mxu0 %v562_v40 }
 0x8da   :  { %1093 = vmatprep.mubr.msk.f32.mxu0 %vm1208_vm4, %v1206_v8  ;;  %1106 = vmatpush3.bf16.msra.mxu0 %v1105_v0 }
 0x8db   :  { %1107 = vmatprep.subr.bf16.mxu0 %v1211_v60 }
 0x8de   :  { %1109 = vmatpush3.bf16.msra.mxu0 %v1108_v6 }
 0x8df   :  { %1110 = vmatprep.subr.bf16.mxu0 %v1211_v60 }
 0x8e2   :  { %1112 = vmatpush3.bf16.msra.mxu0 %v1111_v15 }
 0x8e3   :  { %1113 = vmatprep.subr.bf16.mxu0 %v1211_v60 }
 0x8e6   :  { %1115 = vmatpush3.bf16.msra.mxu0 %v1114_v17 }
 0x8e7   :  { %1116 = vmatprep.subr.bf16.mxu0 %v1211_v60 }
 0x8ea   :  { %1118 = vmatpush3.bf16.msra.mxu0 %v1117_v21 }
 0x8eb   :  { %1119 = vmatprep.subr.bf16.mxu0 %v1211_v60 }
 0x8ee   :  { %1121 = vmatpush3.bf16.msra.mxu0 %v1120_v30 }
 0x8ef   :  { %1122 = vmatprep.subr.bf16.mxu0 %v1211_v60 }
 0x8f2   :  { %1124 = vmatpush3.bf16.msra.mxu0 %v1123_v32 }
 0x8f3   :  { %1125 = vmatprep.subr.bf16.mxu0 %v1211_v60 }
 0x8f6   :  { %1127 = vmatpush3.bf16.msra.mxu0 %v1126_v35 }
 0x9ac   :  { %v597_v42 = vpop.f32.mrb[16].mxu0 }
 0x9ad   :  { %v603_v43 = vadd.f32 %v597_v42, %v165_v41  ;;  %v1039_v44 = vpop.f32.mrb[17].mxu0 }
 0x9ae   :  { %v600_v45 = vpop.f32.mrb[18].mxu0 }
 0x9af   :  { %v806_v46 = vmul.f32 -1.442695, %v603_v43  ;;  %v1040_v47 = vpop.f32.mrb[19].mxu0 }
 0x9b1   :  { %1190 = vpow2.f32 %v806_v46 }
 0x9b2   :  { %1192 = vtanh.f32 %v603_v43 }
 0x9bb   :  { %v1191_v48 = vpop.eup %1190 }
 0x9bc   :  { %v608_v49 = vadd.f32 1.0, %v1191_v48  ;;  %v1193_v50 = vpop.eup %1192 }
 0x9be   :  { %1194 = vrcp.f32 %v608_v49 }
 0x9c8   :  { %v1195_v51 = vpop.eup %1194 }
 0x9c9   :  { %v611_v52 = vsel %vm1336_vm3, %v1193_v50, %v1195_v51 }
 0x9ca   :  { %615 = vrot.lane.b32.xlu0 %v611_v52, %s1210_s13  ;;  %612 = vrot.lane.b32.xlu1 %v611_v52, %s1207_s25 }
 0x9ce   :  { %619 = vrot.lane.b32.xlu1 %v611_v52, %s1209_s26 }
 0xa3c   :  { %v616_v8 = vpop.permute.xlu0 %615  ;;  %v613_v4 = vpop.permute.xlu1 %612 }
 0xa3d   :  { %v617_v53 = vmul.f32 %v616_v8, %v557_v36  ;;  %v614_v54 = vmul.f32 %v613_v4, %v611_v52 }
 0xa3f   :  { %v1523_v55 = vadd.f32 %v617_v53, %v614_v54 }
 0xa40   :  { %v620_v57 = vpop.permute.xlu1 %619 }
 0xa41   :  { %1196 = vtanh.f32 %v1523_v55 }
 0xa4b   :  { %v1197_v56 = vpop.eup %1196 }
 0xa4c   :  { %v622_v58 = vmul.f32 %v1197_v56, %v620_v57 }
 0xa4e   :  { %v623_v59 = vpack.c.bf16 %v622_v58, %v622_v58 }
 0xa50   :  { %1058 = vmatmul.mubr.bf16.vlgmr.msra.gmra.mrb[12].mxu1 %v623_v59 }
 0xb23   :  { %v658_v19 = vpop.f32.mrb[12].mxu1 }
 0xb24   :  { %v664_v20 = vadd.f32 %v658_v19, %v170_v18  ;;  %v1059_v22 = vpop.f32.mrb[13].mxu1 }
 0xb25   :  { %v661_v26 = vpop.f32.mrb[14].mxu1 }
 0xb26   :  { %v807_v27 = vmul.f32 -1.442695, %v664_v20  ;;  %v1060_v9 = vpop.f32.mrb[15].mxu1 }
 0xb28   :  { %1198 = vpow2.f32 %v807_v27 }
 0xb29   :  { %1200 = vtanh.f32 %v664_v20 }
 0xb32   :  { %v1199_v10 = vpop.eup %1198 }
 0xb33   :  { %v669_v11 = vadd.f32 1.0, %v1199_v10  ;;  %v1201_v24 = vpop.eup %1200 }
 0xb35   :  { %1202 = vrcp.f32 %v669_v11 }
 0xb3f   :  { %v1203_v33 = vpop.eup %1202 }
 0xb40   :  { %v672_v34 = vsel %vm1336_vm3, %v1201_v24, %v1203_v33 }
 0xb41   :  { %676 = vrot.lane.b32.xlu1 %v672_v34, %s1210_s13  ;;  %673 = vrot.lane.b32.xlu0 %v672_v34, %s1207_s25 }
 0xb45   :  { %680 = vrot.lane.b32.xlu0 %v672_v34, %s1209_s26 }
 0xbb3   :  { %v677_v36 = vpop.permute.xlu1 %676  ;;  %v674_v37 = vpop.permute.xlu0 %673 }
 0xbb4   :  { %v678_v38 = vmul.f32 %v677_v36, %v1523_v55  ;;  %v675_v39 = vmul.f32 %v674_v37, %v672_v34 }
 0xbb6   :  { %v679_v40 = vadd.f32 %v678_v38, %v675_v39 }
 0xbb7   :  { %v681_v42 = vpop.permute.xlu0 %680 }
 0xbb8   :  { %1204 = vtanh.f32 %v679_v40 }
 0xbc2   :  { %v1205_v41 = vpop.eup %1204 }
 0xbc3   :  { %v683_v43 = vmul.f32 %v1205_v41, %v681_v42 }
 0xbc5   :  { %1094 = vmatmul.mubr.f32.vlgmr.msra.gmra.mrb[20].mxu0 %v683_v43 }
 0xc98   :  { %v773_v44 = vpop.f32.mrb[20].mxu0 }
 0xc99   :  { %v774_v45 = vadd.f32 %v808_v25, %v773_v44  ;;  %v1095_v46 = vpop.f32.mrb[21].mxu0 }
 0xc9b   :  { %778 = vst.msk [vmem:[%s1594_s6] sm:$0xff] %vm777_vm5, %v774_v45 }

</bundles_post_ra>
